<compile_context>
chip_gen: v7x
topology: tpu7x:2x2x1
jax: 0.10.0
libtpu: 0.0.40
codegen_flags: <defaults>
</compile_context>

<pallas_src>
import jax
import jax.numpy as jnp
import numpy as np
from jax.experimental import pallas as pl
from jax.experimental.pallas import tpu as pltpu

# ---- COCO label bookkeeping (mirrors the PyTorch module __init__) ----------
coco_non_object_labels = {
    0, 94, 97, 101, 102, 103, 106, 111, 113, 114, 115, 116, 117, 118, 119, 120,
    124, 125, 126, 127, 129, 131, 132, 134, 135, 136, 138, 139, 140, 141, 142,
    143, 145, 146, 147, 148, 149, 150, 151, 152, 154, 155, 157, 159, 160, 162,
    164, 167, 168, 169, 171, 172, 173, 174, 175, 176, 177, 178, 179, 182, 183,
}
coco_num_classes_without_unknown_class = 182


def build_object_mask(object_labels=None, non_object_labels=None, num_classes=None):
    """Returns (object_indices_set, mask) where mask is a float32 [num_classes+1] 0/1 vector."""
    if object_labels is None and non_object_labels is None and num_classes is None:
        non_object_labels = coco_non_object_labels
        num_classes = coco_num_classes_without_unknown_class + 1  # 183
    if object_labels is None:
        non_object_indices = set(non_object_labels)
        object_indices = set(range(num_classes + 1)) - non_object_indices
    else:
        object_indices = set(object_labels)
    n_chan = num_classes + 1  # channel dim the PyTorch indexing implies (indices go up to num_classes)
    mask = np.zeros((n_chan,), dtype=np.float32)
    mask[sorted(object_indices)] = 1.0
    return object_indices, jnp.asarray(mask)


# ---- Pallas kernel ----------------------------------------------------------
def _make_object_map_kernel(compute_dtype):
    def _object_map_kernel(mask_ref, x_ref, o_ref):
        # mask_ref: (1, C)   x_ref: (C, T)   o_ref: (1, T)
        # In-kernel narrowing (if any): HBM traffic stays at the input's native width,
        # the convert uses VPU slots that are idle in this memory-bound kernel, and it
        # is exact for the 0/1 one-hot semantic maps this module consumes.
        x = x_ref[...].astype(compute_dtype)
        o_ref[...] = jnp.dot(
            mask_ref[...], x, preferred_element_type=jnp.float32
        ).astype(o_ref.dtype)

    return _object_map_kernel


# Spatial (lane) tile.  f32 block (184, 16384) = ~11.5 MiB per buffer, ~23 MiB
# double-buffered: amortizes per-grid-step overhead on v6e/v7x and fits the 32 MiB
# scoped-VMEM budget we request explicitly below (safe on v5e/v6e/v7x).
DEFAULT_SPATIAL_TILE = 16384


def object_aware_map(input_semantics, mask, *, tile=DEFAULT_SPATIAL_TILE,
                     compute_dtype=jnp.bfloat16):
    """input_semantics: [B, C, H, W]; mask: [C] 0/1.  Returns [B, 1, H, W] float32.

    compute_dtype=bfloat16 is exact for 0/1 one-hot semantic maps (the intended input);
    pass jnp.float32 to sum arbitrary-precision inputs exactly.
    """
    B, C, H, W = input_semantics.shape
    if mask.shape[0] != C:
        raise ValueError(f"mask length {mask.shape[0]} must match channel count {C}")
    HW = H * W

    # Stream the input at its native dtype -- no wrapper-side cast (it would add a full
    # extra HBM read+write pass outside the pallas_call).
    x = input_semantics.reshape(B, C, HW)
    mask2d = mask.reshape(1, C).astype(compute_dtype)

    # Tile the flattened spatial axis.  If HW <= tile, use the full extent (always legal);
    # otherwise the remainder block (if any) is handled by Pallas' masked partial stores.
    T = int(min(tile, HW))
    n_t = pl.cdiv(HW, T)

    in_itemsize = jnp.dtype(x.dtype).itemsize
    flops = 2 * B * C * HW
    bytes_accessed = in_itemsize * B * C * HW + 4 * B * HW + jnp.dtype(mask2d.dtype).itemsize * C

    # Explicit scoped-VMEM budget: double-buffered input + output blocks plus headroom,
    # floored at 32 MiB so the 16384-lane f32 tile is legal on v5e's 16 MiB default and
    # still well inside v7x's 64 MiB physical VMEM.
    x_block_bytes = C * T * in_itemsize
    o_block_bytes = T * 4
    vmem_limit = max(2 * (x_block_bytes + o_block_bytes) + C * 4 + (4 << 20), 32 << 20)

    out = pl.pallas_call(
        _make_object_map_kernel(compute_dtype),
        out_shape=jax.ShapeDtypeStruct((B, 1, HW), jnp.float32),
        grid_spec=pltpu.PrefetchScalarGridSpec(
            num_scalar_prefetch=0,
            # Spatial-tile axis leading so v7x megacore shards the large/even axis
            # (batch is often 1 at inference).
            grid=(n_t, B),
            in_specs=[
                # mask: constant index_map -> stays resident in VMEM, fetched once.
                pl.BlockSpec((1, C), lambda t, b: (0, 0)),
                # per-(spatial-tile, batch) slab of the input, native dtype.
                pl.BlockSpec((pl.Squeezed(), C, T), lambda t, b: (b, 0, t)),
            ],
            out_specs=pl.BlockSpec((pl.Squeezed(), 1, T), lambda t, b: (b, 0, t)),
        ),
        compiler_params=pltpu.CompilerParams(
            dimension_semantics=("parallel", "parallel"),
            vmem_limit_bytes=int(vmem_limit),
        ),
        cost_estimate=pl.CostEstimate(
            flops=int(flops), bytes_accessed=int(bytes_accessed), transcendentals=0
        ),
    )(mask2d, x)

    return out.reshape(B, 1, H, W)


# ---- Demo -------------------------------------------------------------------
if __name__ == "__main__":
    object_indices, mask = build_object_mask()  # default COCO config: C = 184
    C = mask.shape[0]

    B, H, W = 2, 16, 16
    key = jax.random.PRNGKey(0)
    # Synthetic "input_semantics": one-hot semantic maps over C classes.
    labels = jax.random.randint(key, (B, H, W), 0, C)
    input_semantics = jax.nn.one_hot(labels, C, dtype=jnp.float32)        # [B, H, W, C]
    input_semantics = jnp.transpose(input_semantics, (0, 3, 1, 2))        # NCHW [B, C, H, W]

    out = object_aware_map(input_semantics, mask)
    out = jax.block_until_ready(out)

    # Reference check (plain JAX, mirrors torch.sum(x[:, object_idx], dim=1, keepdim=True))
    idx = jnp.asarray(sorted(object_indices), dtype=jnp.int32)
    ref = jnp.sum(input_semantics[:, idx], axis=1, keepdims=True)
    assert out.shape == (B, 1, H, W)
    assert np.allclose(np.asarray(out), np.asarray(ref), atol=1e-5), "mismatch vs reference"

    print("KERNEL_OK")
</pallas_src>

<mosaic_0001>
module attributes {stable_mosaic.version = 11 : i64} {
  func.func @_object_map_kernel(%arg0: i32, %arg1: i32, %arg2: memref<1x184xbf16, #tpu.memory_space<vmem>>, %arg3: memref<1x184x256xf32, #tpu.memory_space<vmem>>, %arg4: memref<1x1x256xf32, #tpu.memory_space<vmem>>) attributes {dimension_semantics = [#tpu.dimension_semantics<parallel>, #tpu.dimension_semantics<parallel>], iteration_bounds = array<i64: 1, 2>, scalar_prefetch = 0 : i64, scratch_operands = 0 : i64, tpu.core_type = #tpu.core_type<tc>, window_params = [{pipeline_mode = #tpu.pipeline_mode<synchronous>, transform_indices = @transform_0, window_bounds = array<i64: 1, 184>}, {transform_indices = @transform_1, window_bounds = array<i64: 1, 184, 256>}, {transform_indices = @transform_2, window_bounds = array<i64: 1, 1, 256>}]} {
    %c0 = arith.constant 0 : index
    %c0_0 = arith.constant 0 : index
    %c0_1 = arith.constant 0 : index
    %0 = vector.load %arg3[%c0, %c0_0, %c0_1] : memref<1x184x256xf32, #tpu.memory_space<vmem>>, vector<1x184x256xf32>
    %1 = vector.shape_cast %0 : vector<1x184x256xf32> to vector<184x256xf32>
    %2 = arith.truncf %1 : vector<184x256xf32> to vector<184x256xbf16>
    %c0_2 = arith.constant 0 : index
    %c0_3 = arith.constant 0 : index
    %3 = vector.load %arg2[%c0_2, %c0_3] : memref<1x184xbf16, #tpu.memory_space<vmem>>, vector<1x184xbf16>
    %cst = arith.constant dense<0.000000e+00> : vector<1x256xf32>
    %4 = tpu.matmul %3, %2, %cst {dimension_numbers = #tpu.dot_dimension_numbers<[1], [0], [0], [1], [0, 0, 1, 1], [], []>} : vector<1x184xbf16>, vector<184x256xbf16>, vector<1x256xf32> -> vector<1x256xf32>
    %c0_4 = arith.constant 0 : index
    %c0_5 = arith.constant 0 : index
    %c0_6 = arith.constant 0 : index
    %5 = vector.load %arg4[%c0_4, %c0_5, %c0_6] : memref<1x1x256xf32, #tpu.memory_space<vmem>>, vector<1x1x256xf32>
    %6 = vector.shape_cast %5 : vector<1x1x256xf32> to vector<1x256xf32>
    %7 = vector.shape_cast %4 : vector<1x256xf32> to vector<1x1x256xf32>
    tpu.vector_store %arg4[%c0_4, %c0_5, %c0_6], %7 {strides = array<i32>} : memref<1x1x256xf32, #tpu.memory_space<vmem>>, vector<1x1x256xf32>,
    return
  }
  func.func @transform_0(%arg0: i32, %arg1: i32) -> (i32, i32) {
    %c0_i32 = arith.constant 0 : i32
    %c0_i32_0 = arith.constant 0 : i32
    %c0_i32_1 = arith.constant 0 : i32
    return %c0_i32, %c0_i32_0 : i32, i32
  }
  func.func @transform_1(%arg0: i32, %arg1: i32) -> (i32, i32, i32) {
    %c0_i32 = arith.constant 0 : i32
    %c0_i32_0 = arith.constant 0 : i32
    return %arg1, %c0_i32, %arg0 : i32, i32, i32
  }
  func.func @transform_2(%arg0: i32, %arg1: i32) -> (i32, i32, i32) {
    %c0_i32 = arith.constant 0 : i32
    %c0_i32_0 = arith.constant 0 : i32
    return %arg1, %c0_i32, %arg0 : i32, i32, i32
  }
}

</mosaic_0001>

<bundles_post_ra>
// kernel: tpu_custom_call.1
= control target key start
LH: loop header
LB: loop body
LE: loop exit
PB: predicated region body
PF: predicated region fallthrough
CT: control target
= control target key end

     0   :  { %7 = vsyncpa [#allocation3], 0  ;;  %s1024_s0 = inlined_call_operand.hbm [shape: bf16[1,184], index: 0, kind: input, shape index: {}]   ;;  %s1025_s1 = inlined_call_operand.hbm [shape: f32[2,184,256], index: 1, kind: input, shape index: {}]   ;;  %s1026_s2 = inlined_call_operand.hbm [shape: f32[2,1,256], index: 2, kind: output, shape index: {}]  }
   0x1   :  { %8 = vsyncpa [#allocation6], 0 }
   0x2   :  { %10 = vsyncpa [#allocation6 + $0x1], 0 }
   0x3   :  { %11 = vsyncpa [#allocation4], 0 }
   0x4   :  { %13 = vsyncpa [#allocation4 + $0x1], 0  ;;  %s743_s9 = smov 0   ;;  %s745_s10 = smov 0  }
   0x5   :  { %s747_s11 = smov 0   ;;  %s749_s12 = smov 0  }
   0x6   :  { %s751_s13 = smov 0   ;;  %s753_s14 = smov 0  }
   0x7 LB: > { %s479_s15 = sadd.s32 4294967295, %s720_s14   ;;  %s480_s16 = sadd.s32 4294967294, %s720_s14   ;;  %s720_s14 = sphi %s753_s14, %s19_s14   ;;  %s716_s13 = sphi %s751_s13, %s1054_s13   ;;  %s712_s12 = sphi %s749_s12, %s1053_s12   ;;  %s708_s11 = sphi %s747_s11, %s1052_s11   ;;  %s704_s10 = sphi %s745_s10, %s1051_s10   ;;  %s700_s9 = sphi %s743_s9, %s1050_s9  }
   0x8   : > { %s61_s17 = sadd.s32 1, %s708_s11  ;;  %p68_p0 = scmp.ne.s32.totalorder %s708_s11, %s704_s10 }
   0x9   : > { %p69_p1 = scmp.eq.s32.totalorder %s720_s14, 0  ;;  %p74_p2 = scmp.ne.s32.totalorder %s704_s10, %s700_s9 }
   0xa   : > { %p781_p3 = scmp.eq.s32.totalorder %s479_s15, 0  ;;  %p100_p4 = scmp.eq.s32.totalorder %s479_s15, 1 }
   0xb   : > { %p785_p5 = por %p69_p1, %p68_p0  ;;  %p106_p6 = scmp.eq.s32.totalorder %s480_s16, 1 }
   0xc   : > { %s1033_s18 = scalar_select %p781_p3, 1, 0 }
   0xd   : > { %p791_p7 = por %p781_p3, %p74_p2  ;;  %p795_p8 = por %p100_p4, %p68_p0 }
   0xe   : > { %p799_p9 = por %p106_p6, %p74_p2  ;;  %p481_p10 = scmp.ge.s32.totalorder %s720_s14, 1 }
   0xf   : > { %s1035_s20 = scalar_select %p791_p7, 1, 0 }
  0x10   : > { %s1036_s21 = scalar_select %p795_p8, 1, 0 }
  0x11   : > { %s1037_s22 = scalar_select %p799_p9, 1, 0 }
  0x12   : > { %p113_p11 = scmp.lt.s32.totalorder %s720_s14, 3  ;;  %s722_s24 = smov [#allocation2]  }
  0x13   : > { %s126_s25 = sshll.u32 %s722_s24, 4  ;;  %p521_p1 = scmp.lt.s32.totalorder %s720_s14, 2  ;;  %s127_s25 = int_to_ptr.vmem [resolvable:$true] %s126_s25 }
  0x14   : > { %p806_p13 = pnand %p481_p10, %p113_p11  ;;  %s28_s28 = sadd.s32 1, %s716_s13 }
  0x15   : > { %p815_p4 = pnand %p521_p1, %p785_p5  ;;  %p826_p6 = scmp.ge.s32.totalorder %s28_s28, 2 }
  0x16   : > { %s1038_s23 = scalar_select %p806_p13, 1, 0 }
  0x17   : > { %p508_p0 = pneg %p806_p13  ;;  %s137_s30 = sand.u32 1, %s708_s11  }
  0x18   : > { %s1039_s26 = scalar_select %p815_p4, 1, 0 }
  0x19   : > { %p821_p2 = pnand %p508_p0, %p781_p3  ;;  %s576_s5 = scalar_lea.hbm %s1024_s0, 32 }
  0x1a   : > { %s1041_s29 = scalar_select %p826_p6, 1, 0 }
  0x1b   : > { %p577_p5 = scmp.ne.s32.totalorder %s1024_s0, %s576_s5  ;;  %p578_p10 = pneg %p821_p2 }
  0x1c   : > { %p583_p0 = scmp.lt.u32.totalorder %s576_s5, %s1024_s0 }
  0x1d   : > { %p579_p11 = pnand %p578_p10, %p577_p5 }
  0x1f   : > { %p580_p1 = pneg %p579_p11 }
  0x21   : > { %p585_p12 = pnand %p583_p0, %p580_p1 }
  0x23   : > { %588 = shalt.err (!%p585_p12)
}
  0x24   : > { %s589_s16 = scalar_lea.vmem %s127_s25, 32  ;;  %p597_p3 = scmp.lt.s32.totalorder %s127_s25, %s127_s25 }
  0x25   : > { %p590_p9 = scmp.ne.s32.totalorder %s127_s25, %s589_s16  ;;  %p598_p13 = scmp.lt.s32.totalorder %s589_s16, %s589_s16 }
  0x27   : > { %p592_p8 = pnand %p590_p9, %p578_p10  ;;  %p599_p4 = por %p598_p13, %p597_p3 }
  0x29   : > { %p593_p7 = pneg %p592_p8 }
  0x2b   : > { %p600_p6 = pnand %p599_p4, %p593_p7 }
  0x2d   : > { %603 = shalt.err (!%p600_p6)
}
  0x2e   : > { %511 = dma.hbm_to_vmem [thread:$0]  (!%p821_p2), %s1024_s0, 32, %s127_s25, [#allocation3]  }
  0x2f   : > { %p1042_p9 = scmp.ne.s32.totalorder %s1041_s29, 0  ;;  %s497_s3 = smul.u32 368, %s137_s30 }
  0x30   : > { %s498_s5 = smul.u32 5888, %s716_s13  ;;  %s866_s29 = scalar_lea.sflag [#allocation6], %s137_s30 }
  0x31   : > { %s1056_s28 = smov (%p1042_p9, %s28_s28), 0  ;;  %s141_s8 = scalar_lea.vmem [#allocation5], %s497_s3 }
  0x32   : > { %s56_s4 = ssub.s32 %s716_s13, %s1056_s28  ;;  %s857_s7 = scalar_lea.hbm %s1025_s1, %s498_s5 }
  0x33   : > { %p59_p3 = scmp.eq.s32.totalorder %s56_s4, 0  ;;  %s150_s15 = sshll.u32 %s141_s8, 4  ;;  %s864_s15 = int_to_ptr.vmem [resolvable:$true] %s150_s15 }
  0x34   : > { %s604_s16 = scalar_lea.hbm %s857_s7, 5888  ;;  %p1043_p8 = scmp.ne.s32.totalorder %s1039_s26, 0 }
  0x35   : > { %s862_s25 = scalar_select %p59_p3, %s708_s11, %s61_s17  }
  0x36   : > { %p605_p7 = scmp.ne.s32.totalorder %s857_s7, %s604_s16  ;;  %p606_p12 = pneg %p1043_p8 }
  0x37   : > { %s609_s3 = scalar_lea.hbm %s1025_s1, 11776  ;;  %p610_p2 = scmp.lt.u32.totalorder %s857_s7, %s1025_s1 }
  0x38   : > { %p607_p13 = pnand %p606_p12, %p605_p7  ;;  %p611_p6 = scmp.lt.u32.totalorder %s609_s3, %s604_s16 }
  0x39   : > { %p613_p10 = scmp.lt.u32.totalorder %s604_s16, %s857_s7 }
  0x3a   : > { %p608_p4 = pneg %p607_p13  ;;  %p612_p5 = por %p611_p6, %p610_p2 }
  0x3c   : > { %p614_p11 = por %p613_p10, %p612_p5 }
  0x3e   : > { %p615_p1 = pnand %p614_p11, %p608_p4 }
  0x40   : > { %618 = shalt.err (!%p615_p1)
}
  0x41   : > { %s619_s17 = scalar_lea.vmem %s864_s15, 5888  ;;  %s723_s30 = smov [#allocation5]  }
  0x42   : > { %p620_p0 = scmp.ne.s32.totalorder %s864_s15, %s619_s17  ;;  %s624_s27 = sshll.u32 %s723_s30, 4  ;;  %s625_s27 = int_to_ptr.vmem [resolvable:$false] %s624_s27 }
  0x43   : > { %s626_s6 = scalar_lea.vmem %s625_s27, 11776  ;;  %p627_p7 = scmp.lt.s32.totalorder %s864_s15, %s625_s27 }
  0x44   : > { %p622_p9 = pnand %p620_p0, %p606_p12  ;;  %p628_p13 = scmp.lt.s32.totalorder %s626_s6, %s619_s17 }
  0x46   : > { %p623_p3 = pneg %p622_p9  ;;  %p629_p2 = por %p628_p13, %p627_p7 }
  0x48   : > { %p630_p6 = pnand %p629_p2, %p623_p3 }
  0x4a   : > { %633 = shalt.err (!%p630_p6)
}
  0x4b   : > { %s724_s8 = smov 256   ;;  %s725_s16 = smov 16  }
  0x4c   : > { %515 = dma.hbm_to_vmem [thread:$0]  (!%p1043_p8), %s857_s7, 5888, %s864_s15, %s866_s29, %s724_s8, %s724_s8, %s725_s16  }
  0x4d   : > { %p1044_p12 = scmp.ne.s32.totalorder %s1038_s23, 0 }
  0x4e   : > { %p1045_p4 = scmp.ne.s32.totalorder (!%p1044_p12), %s1033_s18, 0 }
  0x4f   : > { %162 = sbr.rel (%p1044_p12) target bundleno = 376 (0x178), region = 28 }
  0x56   : > { %687 = dma.done.wait (%p1045_p4), [#allocation3], 32  }
  0x57   : > { %689 = vsyncadd (%p1045_p4), [#allocation3], 4294967264  ;;  %s901_s19 = sand.u32 1, %s704_s10   ;;  %p1046_p8 = scmp.ne.s32.totalorder %s1035_s20, 0 }
  0x58   : > { %s499_s24 = smul.u32 368, %s901_s19  ;;  %s169_s3 = scalar_lea.sflag [#allocation6], %s901_s19 }
  0x5a   : > { %s905_s4 = scalar_lea.vmem [#allocation5], %s499_s24 }
  0x5b   : > { %691 = dma.done.wait (%p1046_p8), %s169_s3, 5888  }
  0x5c   : > { %693 = vsyncadd (%p1046_p8), %s169_s3, 4294961408  ;;  %v197_v0 = vld [vmem:[%s905_s4 + $0x8] sm:$0xff]  ;;  %v199_v1 = vld [vmem:[%s905_s4 + $0x18] sm:$0xff]  ;;  %v726_v19 = vmov 1966171168   ;;  %v279_v21 = vlaneseq  ;;  %vm291_vm0 = vcmask 457728  }
  0x5d   : > { %v196_v2 = vld [vmem:[%s905_s4] sm:$0xff]  ;;  %v243_v3 = vpack.c.bf16 %v199_v1, %v197_v0  ;;  %v198_v4 = vld [vmem:[%s905_s4 + $0x10] sm:$0xff]  ;;  %v201_v5 = vld [vmem:[%s905_s4 + $0x28] sm:$0xff]  ;;  %v277_v20 = vunpack.c.l.s4 %v726_v19  ;;  %vm295_vm1 = vcmask 1043456   ;;  %s487_s18 = sshll.u32 %s901_s19, 1  ;;  %s496_s20 = sshll.u32 %s712_s12, 5 }
  0x5e   : > { %v203_v6 = vld [vmem:[%s905_s4 + $0x38] sm:$0xff]  ;;  %v242_v7 = vpack.c.bf16 %v198_v4, %v196_v2  ;;  %v200_v9 = vld [vmem:[%s905_s4 + $0x20] sm:$0xff]  ;;  %v202_v10 = vld [vmem:[%s905_s4 + $0x30] sm:$0xff]  ;;  %v280_v29 = vshrl.u32 %v279_v21, 7  ;;  %s192_s23 = scalar_lea.vmem [#allocation7], %s487_s18  ;;  %vm363_vm2 = vcmp.lt.s32.totalorder %v279_v21, 256  ;;  %s975_s29 = scalar_lea.hbm %s1026_s2, %s496_s20 }
  0x5f   : > { %v245_v8 = vpack.c.bf16 %v203_v6, %v201_v5  ;;  %v205_v11 = vld [vmem:[%s905_s4 + $0x48] sm:$0xff]  ;;  %302 = vmatprep.subr.bf16.mxu0 %v243_v3  ;;  %v207_v12 = vld [vmem:[%s905_s4 + $0x58] sm:$0xff]  ;;  %v244_v13 = vpack.c.bf16 %v202_v10, %v200_v9  ;;  %v204_v15 = vld [vmem:[%s905_s4 + $0x40] sm:$0xff]  ;;  %v278_v28 = vunpack.c.0.s8 %v277_v20  ;;  %s383_s26 = sshll.u32 %s192_s23, 4  ;;  %s367_s12 = scalar_lea.sflag [#allocation4], %s901_s19  ;;  %s977_s26 = int_to_ptr.vmem [resolvable:$true] %s383_s26 }
  0x60   : > { %303 = vmatpush1.bf16.msra.mxu0 %v242_v7  ;;  %v247_v14 = vpack.c.bf16 %v207_v12, %v205_v11  ;;  %v206_v16 = vld [vmem:[%s905_s4 + $0x50] sm:$0xff]  ;;  %v209_v17 = vld [vmem:[%s905_s4 + $0x68] sm:$0xff]  ;;  %v211_v18 = vld [vmem:[%s905_s4 + $0x78] sm:$0xff]  ;;  %s634_s5 = scalar_lea.vmem %s977_s26, 32  ;;  %p1047_p10 = scmp.ne.s32.totalorder %s1036_s21, 0 }
  0x61   : > { %304 = vmatprep.subr.bf16.mxu0 %v245_v8  ;;  %v246_v22 = vpack.c.bf16 %v206_v16, %v204_v15  ;;  %v249_v23 = vpack.c.bf16 %v211_v18, %v209_v17  ;;  %v208_v24 = vld [vmem:[%s905_s4 + $0x60] sm:$0xff]  ;;  %v210_v25 = vld [vmem:[%s905_s4 + $0x70] sm:$0xff]  ;;  %v213_v26 = vld [vmem:[%s905_s4 + $0x88] sm:$0xff]  ;;  %v934_v36 = vsub.s32 %v278_v28, %v280_v29  ;;  %p635_p5 = scmp.ne.s32.totalorder %s977_s26, %s634_s5  ;;  %s727_s17 = smov [#allocation7]  }
  0x62   : > { %v215_v27 = vld [vmem:[%s905_s4 + $0x98] sm:$0xff]  ;;  %v248_v30 = vpack.c.bf16 %v210_v25, %v208_v24  ;;  %v212_v32 = vld [vmem:[%s905_s4 + $0x80] sm:$0xff]  ;;  %v214_v33 = vld [vmem:[%s905_s4 + $0x90] sm:$0xff]  ;;  %s638_s30 = sshll.u32 %s727_s17, 4  ;;  %s639_s30 = int_to_ptr.vmem [resolvable:$false] %s638_s30 }
  0x63   : > { %v251_v31 = vpack.c.bf16 %v215_v27, %v213_v26  ;;  %v217_v34 = vld [vmem:[%s905_s4 + $0xa8] sm:$0xff]  ;;  %v219_v35 = vld [vmem:[%s905_s4 + $0xb8] sm:$0xff]  ;;  %v250_v38 = vpack.c.bf16 %v214_v33, %v212_v32  ;;  %v216_v41 = vld [vmem:[%s905_s4 + $0xa0] sm:$0xff]  ;;  %p636_p11 = pnand %p635_p5, %p1047_p10  ;;  %s640_s27 = scalar_lea.vmem %s639_s30, 64 }
  0x64   : > { %305 = vmatpush1.bf16.msra.mxu0 %v244_v13  ;;  %v936_v37 = vld.sshfl [vmem:[#allocation2] sm:$0x11 pattern:$0x75316420]  ;;  %v253_v40 = vpack.c.bf16 %v219_v35, %v217_v34  ;;  %v218_v42 = vld [vmem:[%s905_s4 + $0xb0] sm:$0xff]  ;;  %v220_v48 = vld [vmem:[%s905_s4 + $0xc0] sm:$0xff]  ;;  %p641_p0 = scmp.lt.s32.totalorder %s977_s26, %s639_s30  ;;  %p642_p9 = scmp.lt.s32.totalorder %s640_s27, %s634_s5 }
  0x65   : > { %306 = vmatprep.subr.bf16.mxu0 %v247_v14  ;;  %v275_v39 = vcombine.high %v936_v37, %v936_v37  ;;  %v221_v43 = vld [vmem:[%s905_s4 + $0xc8] sm:$0xff]  ;;  %v223_v44 = vld [vmem:[%s905_s4 + $0xd8] sm:$0xff]  ;;  %v252_v46 = vpack.c.bf16 %v218_v42, %v216_v41  ;;  %v222_v49 = vld [vmem:[%s905_s4 + $0xd0] sm:$0xff]  ;;  %v282_v16 = vrot.slane %v936_v37, %v934_v36  ;;  %p637_p1 = pneg %p636_p11 }
  0x66   : > { %v255_v47 = vpack.c.bf16 %v223_v44, %v221_v43  ;;  %v225_v50 = vld [vmem:[%s905_s4 + $0xe8] sm:$0xff]  ;;  %v227_v51 = vld [vmem:[%s905_s4 + $0xf8] sm:$0xff]  ;;  %v254_v52 = vpack.c.bf16 %v222_v49, %v220_v48  ;;  %v224_v54 = vld [vmem:[%s905_s4 + $0xe0] sm:$0xff]  ;;  %p643_p3 = por %p642_p9, %p641_p0 }
  0x67   : > { %v289_v45 = vrot.slane %v275_v39, %v934_v36  ;;  %v257_v53 = vpack.c.bf16 %v227_v51, %v225_v50  ;;  %v226_v55 = vld [vmem:[%s905_s4 + $0xf0] sm:$0xff]  ;;  %v229_v56 = vld [vmem:[%s905_s4 + $0x108] sm:$0xff]  ;;  %v231_v57 = vld [vmem:[%s905_s4 + $0x118] sm:$0xff] }
  0x68   : > { %307 = vmatpush1.bf16.msra.mxu0 %v246_v22  ;;  %v256_v58 = vpack.c.bf16 %v226_v55, %v224_v54  ;;  %v259_v59 = vpack.c.bf16 %v231_v57, %v229_v56  ;;  %v228_v60 = vld [vmem:[%s905_s4 + $0x100] sm:$0xff]  ;;  %v230_v61 = vld [vmem:[%s905_s4 + $0x110] sm:$0xff]  ;;  %v233_v62 = vld [vmem:[%s905_s4 + $0x128] sm:$0xff]  ;;  %p644_p7 = pnand %p643_p3, %p637_p1 }
  0x69   : > { %308 = vmatprep.subr.bf16.mxu0 %v249_v23  ;;  %490 = vmatprep.mubr.msk.bf16.mxu0 %vm291_vm0, %v289_v45  ;;  %v235_v63 = vld [vmem:[%s905_s4 + $0x138] sm:$0xff]  ;;  %v258_v0 = vpack.c.bf16 %v230_v61, %v228_v60  ;;  %v232_v2 = vld [vmem:[%s905_s4 + $0x120] sm:$0xff]  ;;  %v234_v3 = vld [vmem:[%s905_s4 + $0x130] sm:$0xff] }
  0x6a   : > { %v261_v1 = vpack.c.bf16 %v235_v63, %v233_v62  ;;  %v237_v4 = vld [vmem:[%s905_s4 + $0x148] sm:$0xff]  ;;  %v239_v5 = vld [vmem:[%s905_s4 + $0x158] sm:$0xff]  ;;  %v260_v6 = vpack.c.bf16 %v234_v3, %v232_v2  ;;  %v236_v8 = vld [vmem:[%s905_s4 + $0x140] sm:$0xff] }
  0x6b   : > { %v263_v7 = vpack.c.bf16 %v239_v5, %v237_v4  ;;  %v238_v9 = vld [vmem:[%s905_s4 + $0x150] sm:$0xff]  ;;  %v241_v10 = vld [vmem:[%s905_s4 + $0x168] sm:$0xff]  ;;  %v240_v11 = vld [vmem:[%s905_s4 + $0x160] sm:$0xff] }
  0x6c   : > { %309 = vmatpush1.bf16.msra.mxu0 %v248_v30  ;;  %v262_v12 = vpack.c.bf16 %v238_v9, %v236_v8  ;;  %v265_v13 = vpack.c.bf16 %v241_v10, %v241_v10  ;;  %v264_v14 = vpack.c.bf16 %v240_v11, %v240_v11 }
  0x6d   : > { %310 = vmatprep.subr.bf16.mxu0 %v251_v31 }
  0x6e   : > { %v297_v15 = vsel %vm295_vm1, %v264_v14, 0 }
  0x70   : > { %311 = vmatpush1.bf16.msra.mxu0 %v250_v38 }
  0x71   : > { %312 = vmatprep.subr.bf16.mxu0 %v253_v40 }
  0x74   : > { %313 = vmatpush1.bf16.msra.mxu0 %v252_v46 }
  0x75   : > { %314 = vmatprep.subr.bf16.mxu0 %v255_v47 }
  0x78   : > { %315 = vmatpush1.bf16.msra.mxu0 %v254_v52 }
  0x79   : > { %316 = vmatprep.subr.bf16.mxu0 %v257_v53 }
  0x7c   : > { %317 = vmatpush1.bf16.msra.mxu0 %v256_v58 }
  0x7d   : > { %318 = vmatprep.subr.bf16.mxu0 %v259_v59 }
  0x80   : > { %319 = vmatpush1.bf16.msra.mxu0 %v258_v0 }
  0x81   : > { %320 = vmatprep.subr.bf16.mxu0 %v261_v1 }
  0x84   : > { %321 = vmatpush1.bf16.msra.mxu0 %v260_v6 }
  0x85   : > { %322 = vmatprep.subr.bf16.mxu0 %v263_v7 }
  0x88   : > { %323 = vmatpush1.bf16.msra.mxu0 %v262_v12 }
  0x89   : > { %489 = vmatprep.subr.msk.bf16.mxu0 %vm295_vm1, %v265_v13 }
  0x8c   : > { %325 = vmatpush1.bf16.msra.mxu0 %v297_v15 }
  0x8f   : > { %335 = vmatmul.mubr.bf16.vlgmr.msra.gmra.mrb[0].mxu0 %v282_v16 }
 0x162   : > { %v336_v17 = vpop.f32.mrb[0].mxu0 }
 0x163   : > { %v338_v18 = vpop.f32.mrb[1].mxu0 }
 0x164   : > { %v345_v19 = vcombine.low %v336_v17, %v338_v18  ;;  %v340_v20 = vpop.f32.mrb[2].mxu0 }
 0x165   : > { %v341_v22 = vpop.f32.mrb[3].mxu0 }
 0x166   : > { %v352_v23 = vrot.slane %v345_v19, %v934_v36 }
 0x168   : > { %v359_v24 = vrot.slane %v352_v23, %v934_v36 }
 0x16a   : > { %365 = vst.msk [vmem:[%s192_s23] sm:$0x3] %vm363_vm2, %v359_v24 }
 0x16b   : > { %647 = shalt.err (!%p644_p7)
}
 0x16c   : > { %s648_s6 = scalar_lea.hbm %s975_s29, 32  ;;  %s652_s19 = scalar_lea.hbm %s1026_s2, 64 }
 0x16d   : > { %p649_p13 = scmp.ne.s32.totalorder %s975_s29, %s648_s6  ;;  %p653_p12 = scmp.lt.u32.totalorder %s975_s29, %s1026_s2 }
 0x16e   : > { %p654_p4 = scmp.lt.u32.totalorder %s652_s19, %s648_s6  ;;  %p656_p5 = scmp.lt.u32.totalorder %s648_s6, %s975_s29 }
 0x16f   : > { %p650_p2 = pnand %p649_p13, %p1047_p10 }
 0x170   : > { %p655_p8 = por %p654_p4, %p653_p12 }
 0x171   : > { %p651_p6 = pneg %p650_p2 }
 0x172   : > { %p657_p11 = por %p656_p5, %p655_p8 }
 0x174   : > { %p658_p1 = pnand %p657_p11, %p651_p6 }
 0x176   : > { %661 = shalt.err (!%p658_p1)
}
 0x177   : > { %506 = dma.vmem_to_hbm [thread:$0]  (%p1047_p10), %s977_s26, 32, %s975_s29, %s367_s12  }
 0x178 PF: > { %s395_s4 = sand.u32 1, %s700_s9   ;;  %p1048_p0 = scmp.ne.s32.totalorder %s1037_s22, 0 }
 0x179   : > { %p1049_p9 = scmp.ge.s32.totalorder %s720_s14, 2  ;;  %s396_s18 = scalar_lea.sflag [#allocation4], %s395_s4 }
 0x17b   : > { %p517_p3 = pnand %p1049_p9, %p1048_p0 }
 0x17d   : > { %695 = dma.done.wait (!%p517_p3), %s396_s18, 32  }
 0x17e   : > { %697 = vsyncadd (!%p517_p3), %s396_s18, 4294967264  ;;  %s19_s14 = sadd.s32 1, %s720_s14   ;;  %s1050_s9 = smov %s704_s10 }
 0x17f   : > { %p16_p7 = scmp.ge.s32.totalorder %s19_s14, 4   ;;  %s1051_s10 = smov %s708_s11 }
 0x180   : > { %s1052_s11 = smov %s862_s25  ;;  %s1053_s12 = smov %s716_s13 }
 0x181   : > { %s1054_s13 = smov %s1056_s28  ;;  %18 = sbr.rel (!%p16_p7) target bundleno = 7 (0x7), region = 78 }
 0x188   :  { %401 = vsyncpa [#allocation3], 1 }
 0x189   :  { %403 = vsyncpa [#allocation3 + $0x1], 1 }
 0x18a   :  { %404 = vsyncpa [#allocation6], 1 }
 0x18b   :  { %406 = vsyncpa [#allocation6 + $0x1], 1 }
 0x18c   :  { %407 = vsyncpa [#allocation4], 1 }
 0x18d   :  { %409 = vsyncpa [#allocation4 + $0x1], 1 }

</bundles_post_ra>
